<compile_context>
chip_gen: v6e
topology: v6e:2x2x1
jax: 0.10.0
libtpu: 0.0.40
codegen_flags: <defaults>
</compile_context>

<pallas_src>
import functools

import jax
import jax.numpy as jnp
from jax.experimental import pallas as pl
from jax.experimental.pallas import tpu as pltpu


# Conservative scoped-VMEM budget that fits every generation (v7x has 64 MiB total).
_VMEM_BUDGET = 48 * 1024 * 1024


def _relu(x):
    return jnp.maximum(x, 0.0)


def _round_up(x: int, m: int) -> int:
    return ((x + m - 1) // m) * m


def _sublane_multiple(dtype) -> int:
    # f32 -> 8 rows per vreg, bf16 -> 16, int8/fp8 -> 32 (sublane packing).
    return {4: 8, 2: 16, 1: 32}.get(jnp.dtype(dtype).itemsize, 8)


def _vmem_limit(nbytes_needed: int) -> int:
    return min(max(int(nbytes_needed * 1.25) + (2 << 20), 16 << 20), 64 << 20)


# -----------------------------------------------------------------------------
# Parameter prep (hoist out of any time loop / scan)
# -----------------------------------------------------------------------------
def prepare_plrnn_params(a_diag, w, bias, *, compute_dtype, matmul_dtype=None):
    """Mask the diagonal, transpose to MXU-natural layout, and lane-pad. Do ONCE."""
    Z = w.shape[0]
    Zp = _round_up(max(Z, 128), 128)
    mm_dtype = jnp.dtype(matmul_dtype) if matmul_dtype is not None else jnp.dtype(compute_dtype)

    w_off_t = (w * (1.0 - jnp.eye(Z, dtype=w.dtype))).T          # (Z, Z) = (W*M)^T
    wt_p = jnp.zeros((Zp, Zp), mm_dtype).at[:Z, :Z].set(w_off_t.astype(mm_dtype))
    a_p = jnp.zeros((1, Zp), compute_dtype).at[0, :Z].set(a_diag.astype(compute_dtype))
    b_p = jnp.zeros((1, Zp), compute_dtype).at[0, :Z].set(bias.astype(compute_dtype))
    return wt_p, a_p, b_p, Z


# -----------------------------------------------------------------------------
# Kernel bodies
# -----------------------------------------------------------------------------
def _plrnn_step(z, a, b, wt, *, phi, valid_z):
    """a*z + phi(z) @ (W*M)^T + b. All elementwise math in f32; matmul in wt.dtype."""
    phi_z = phi(z)
    Zp = z.shape[-1]
    if valid_z < Zp:
        # Zero the padded lanes of phi(z): padded rows/cols of W are already zero,
        # but a non-finite phi(0) would give NaN*0 = NaN in valid output columns.
        lane = jax.lax.broadcasted_iota(jnp.int32, z.shape, dimension=1)
        phi_z = jnp.where(lane < valid_z, phi_z, 0.0)
    off = jnp.dot(phi_z.astype(wt.dtype), wt, preferred_element_type=jnp.float32)
    return a * z + off + b


def _plrnn_kernel(z_ref, a_ref, wt_ref, b_ref, o_ref, *, phi, valid_z):
    z = z_ref[...].astype(jnp.float32)       # (bm, Zp)
    a = a_ref[...].astype(jnp.float32)       # (1, Zp)
    b = b_ref[...].astype(jnp.float32)       # (1, Zp)
    out = _plrnn_step(z, a, b, wt_ref[...], phi=phi, valid_z=valid_z)
    o_ref[...] = out.astype(o_ref.dtype)


def _plrnn_rollout_kernel(z0_ref, a_ref, wt_ref, b_ref, traj_ref, z_sc, *, phi, valid_z):
    t = pl.program_id(0)

    @pl.when(t == 0)
    def _():
        z_sc[...] = z0_ref[...].astype(jnp.float32)

    a = a_ref[...].astype(jnp.float32)
    b = b_ref[...].astype(jnp.float32)
    z_new = _plrnn_step(z_sc[...], a, b, wt_ref[...], phi=phi, valid_z=valid_z)
    z_sc[...] = z_new
    traj_ref[...] = z_new.astype(traj_ref.dtype)


# -----------------------------------------------------------------------------
# Wrappers
# -----------------------------------------------------------------------------
def plrnn_forward_prepared(z, params, *, phi=_relu, transcendentals_per_elem=0):
    """Single PLRNN step with pre-prepared (padded) parameters."""
    wt_p, a_p, b_p, Z = params
    B, Zin = z.shape
    assert Zin == Z, f"z feature dim {Zin} != z_dim {Z}"
    dtype = z.dtype
    Zp = wt_p.shape[0]
    sub = _sublane_multiple(dtype)
    io_item = jnp.dtype(dtype).itemsize
    w_bytes = wt_p.size * wt_p.dtype.itemsize
    small_bytes = (a_p.size + b_p.size) * jnp.dtype(a_p.dtype).itemsize

    # Largest batch tile (<= 512 rows) whose double-buffered z+out tiles fit next to
    # the single-buffered resident weight inside the VMEM budget.
    per_row = 2 * 2 * Zp * io_item                      # 2 bufs x (z tile + out tile)
    avail = max(_VMEM_BUDGET - w_bytes - small_bytes, per_row * sub)
    bm_max = min(512, max(sub, ((avail // per_row) // sub) * sub))
    # TODO(synk): when Zp^2*itemsize alone exceeds the VMEM budget (Z >~ 3500 in f32),
    # add a K/N-tiled path (extra "arbitrary" grid axes + f32 accumulator scratch)
    # instead of keeping W fully resident.

    if B > bm_max:
        bm = bm_max
        Bp = _round_up(B, bm)
    elif B > sub:
        # Split into >= 2 batch tiles so the "parallel" axis can shard across
        # both TensorCores on v7x.
        bm = _round_up((B + 1) // 2, sub)
        Bp = 2 * bm
    else:
        bm = sub
        Bp = sub

    z_p = jnp.zeros((Bp, Zp), dtype).at[:B, :Z].set(z)
    grid = (Bp // bm,)

    cost = pl.CostEstimate(
        flops=2 * Bp * Zp * Zp + 4 * Bp * Zp,
        transcendentals=transcendentals_per_elem * Bp * Zp,
        bytes_accessed=2 * Bp * Zp * io_item + w_bytes + small_bytes,
    )
    vmem_need = w_bytes + small_bytes + 2 * 2 * bm * Zp * io_item

    out_p = pl.pallas_call(
        functools.partial(_plrnn_kernel, phi=phi, valid_z=Z),
        out_shape=jax.ShapeDtypeStruct((Bp, Zp), dtype),
        grid=grid,
        in_specs=[
            # z: pipelined (double-buffered) over batch tiles.
            pl.BlockSpec((bm, Zp), lambda i: (i, 0)),
            # a, (W*M)^T, bias: constant index map -> fetched once, single-buffered.
            pl.BlockSpec((1, Zp), lambda i: (0, 0), pipeline_mode=pl.Buffered(1)),
            pl.BlockSpec((Zp, Zp), lambda i: (0, 0), pipeline_mode=pl.Buffered(1)),
            pl.BlockSpec((1, Zp), lambda i: (0, 0), pipeline_mode=pl.Buffered(1)),
        ],
        out_specs=pl.BlockSpec((bm, Zp), lambda i: (i, 0)),
        compiler_params=pltpu.CompilerParams(
            dimension_semantics=("parallel",),
            vmem_limit_bytes=_vmem_limit(vmem_need),
        ),
        cost_estimate=cost,
    )(z_p, a_p, wt_p, b_p)

    return out_p[:B, :Z]


def plrnn_forward(z, a_diag, w, bias, *, phi=_relu, matmul_dtype=None,
                  transcendentals_per_elem=0):
    """Single PLRNN step: a*z + phi(z) @ (W*offdiag_mask)^T + bias."""
    params = prepare_plrnn_params(a_diag, w, bias, compute_dtype=z.dtype,
                                  matmul_dtype=matmul_dtype)
    return plrnn_forward_prepared(z, params, phi=phi,
                                  transcendentals_per_elem=transcendentals_per_elem)


def plrnn_rollout(z0, a_diag, w, bias, num_steps, *, phi=_relu, matmul_dtype=None,
                  transcendentals_per_elem=0):
    """Fused recurrence: T applications of the PLRNN step in one pallas_call.

    Weights stay resident in VMEM for all steps; z is carried in a VMEM scratch.
    Returns the trajectory (num_steps, B, Z) of z_1..z_T.
    """
    B, Z = z0.shape
    dtype = z0.dtype
    wt_p, a_p, b_p, _ = prepare_plrnn_params(a_diag, w, bias, compute_dtype=dtype,
                                             matmul_dtype=matmul_dtype)
    Zp = wt_p.shape[0]
    sub = _sublane_multiple(dtype)
    Bp = _round_up(max(B, sub), sub)
    io_item = jnp.dtype(dtype).itemsize
    w_bytes = wt_p.size * wt_p.dtype.itemsize
    small_bytes = (a_p.size + b_p.size) * jnp.dtype(a_p.dtype).itemsize

    z0_p = jnp.zeros((Bp, Zp), dtype).at[:B, :Z].set(z0)

    cost = pl.CostEstimate(
        flops=num_steps * (2 * Bp * Zp * Zp + 4 * Bp * Zp),
        transcendentals=num_steps * transcendentals_per_elem * Bp * Zp,
        bytes_accessed=w_bytes + small_bytes + Bp * Zp * io_item * (1 + num_steps),
    )
    # z0 + scratch(f32) + 2x output buffers + resident weight / a / b.
    vmem_need = (w_bytes + small_bytes + Bp * Zp * io_item + Bp * Zp * 4
                 + 2 * Bp * Zp * io_item)

    traj_p = pl.pallas_call(
        functools.partial(_plrnn_rollout_kernel, phi=phi, valid_z=Z),
        out_shape=jax.ShapeDtypeStruct((num_steps, Bp, Zp), dtype),
        grid=(num_steps,),
        in_specs=[
            pl.BlockSpec((Bp, Zp), lambda t: (0, 0), pipeline_mode=pl.Buffered(1)),
            pl.BlockSpec((1, Zp), lambda t: (0, 0), pipeline_mode=pl.Buffered(1)),
            pl.BlockSpec((Zp, Zp), lambda t: (0, 0), pipeline_mode=pl.Buffered(1)),
            pl.BlockSpec((1, Zp), lambda t: (0, 0), pipeline_mode=pl.Buffered(1)),
        ],
        out_specs=pl.BlockSpec((None, Bp, Zp), lambda t: (t, 0, 0)),
        scratch_shapes=[pltpu.VMEM((Bp, Zp), jnp.float32)],
        compiler_params=pltpu.CompilerParams(
            dimension_semantics=("arbitrary",),   # sequential recurrence
            vmem_limit_bytes=_vmem_limit(vmem_need),
        ),
        cost_estimate=cost,
    )(z0_p, a_p, wt_p, b_p)

    return traj_p[:, :B, :Z]


# -----------------------------------------------------------------------------
# Reference & self-test
# -----------------------------------------------------------------------------
def plrnn_reference(z, a_diag, w, bias, *, phi=_relu):
    Z = w.shape[0]
    mask = 1.0 - jnp.eye(Z, dtype=w.dtype)
    return a_diag[None, :] * z + phi(z) @ (w * mask).T + bias[None, :]


if __name__ == "__main__":
    B, Z, T = 16, 32, 6
    key = jax.random.PRNGKey(0)
    k_z, k_a, k_w, k_b = jax.random.split(key, 4)

    z = jax.random.normal(k_z, (B, Z), dtype=jnp.float32)
    a_diag = jax.random.uniform(k_a, (Z,), dtype=jnp.float32, minval=-0.5, maxval=0.5)
    w = jax.random.normal(k_w, (Z, Z), dtype=jnp.float32) * (1.0 / jnp.sqrt(Z))
    bias = jax.random.normal(k_b, (Z,), dtype=jnp.float32) * 0.1

    ref = plrnn_reference(z, a_diag, w, bias)

    # 1) single forward step (matches PLRNN.forward), f32 matmul operands.
    out = jax.block_until_ready(plrnn_forward(z, a_diag, w, bias))
    assert out.shape == (B, Z)
    assert jnp.allclose(out, ref, atol=1e-5, rtol=1e-5), "f32 kernel mismatch vs reference"

    # 2) bf16-operand matmul path (MXU-native on v6e/v7x), f32 accumulation.
    out_bf16 = jax.block_until_ready(
        plrnn_forward(z, a_diag, w, bias, matmul_dtype=jnp.bfloat16))
    assert jnp.allclose(out_bf16, ref, atol=1e-1, rtol=1e-1), "bf16 kernel mismatch vs reference"

    # 3) fused recurrence: T steps in one pallas_call, weights resident in VMEM.
    traj = jax.block_until_ready(plrnn_rollout(z, a_diag, w, bias, T))
    assert traj.shape == (T, B, Z)
    z_step = z
    for t in range(T):
        z_step = plrnn_reference(z_step, a_diag, w, bias)
        assert jnp.allclose(traj[t], z_step, atol=1e-4, rtol=1e-4), f"rollout mismatch at step {t}"

    print("KERNEL_OK")
</pallas_src>

<mosaic_0001>
module attributes {stable_mosaic.version = 11 : i64} {
  func.func @_plrnn_kernel(%arg0: i32, %arg1: memref<8x128xf32, #tpu.memory_space<vmem>>, %arg2: memref<1x128xf32, #tpu.memory_space<vmem>>, %arg3: memref<128x128xf32, #tpu.memory_space<vmem>>, %arg4: memref<1x128xf32, #tpu.memory_space<vmem>>, %arg5: memref<8x128xf32, #tpu.memory_space<vmem>>) attributes {dimension_semantics = [#tpu.dimension_semantics<parallel>], iteration_bounds = array<i64: 2>, scalar_prefetch = 0 : i64, scratch_operands = 0 : i64, tpu.core_type = #tpu.core_type<tc>, window_params = [{transform_indices = @transform_0, window_bounds = array<i64: 8, 128>}, {pipeline_mode = #tpu.pipeline_mode<synchronous>, transform_indices = @transform_1, window_bounds = array<i64: 1, 128>}, {pipeline_mode = #tpu.pipeline_mode<synchronous>, transform_indices = @transform_2, window_bounds = array<i64: 128, 128>}, {pipeline_mode = #tpu.pipeline_mode<synchronous>, transform_indices = @transform_3, window_bounds = array<i64: 1, 128>}, {transform_indices = @transform_4, window_bounds = array<i64: 8, 128>}]} {
    %c0 = arith.constant 0 : index
    %c0_0 = arith.constant 0 : index
    %0 = vector.load %arg1[%c0, %c0_0] : memref<8x128xf32, #tpu.memory_space<vmem>>, vector<8x128xf32>
    %c0_1 = arith.constant 0 : index
    %c0_2 = arith.constant 0 : index
    %1 = vector.load %arg2[%c0_1, %c0_2] : memref<1x128xf32, #tpu.memory_space<vmem>>, vector<1x128xf32>
    %c0_3 = arith.constant 0 : index
    %c0_4 = arith.constant 0 : index
    %2 = vector.load %arg4[%c0_3, %c0_4] : memref<1x128xf32, #tpu.memory_space<vmem>>, vector<1x128xf32>
    %c0_5 = arith.constant 0 : index
    %c0_6 = arith.constant 0 : index
    %3 = vector.load %arg3[%c0_5, %c0_6] : memref<128x128xf32, #tpu.memory_space<vmem>>, vector<128x128xf32>
    %cst = arith.constant 0.000000e+00 : f32
    %4 = vector.broadcast %cst : f32 to vector<8x128xf32>
    %5 = arith.maximumf %0, %4 : vector<8x128xf32>
    %6 = tpu.iota {dimensions = array<i32: 1>} : vector<8x128xi32>
    %c32_i32 = arith.constant 32 : i32
    %7 = vector.broadcast %c32_i32 : i32 to vector<8x128xi32>
    %8 = arith.cmpi slt, %6, %7 : vector<8x128xi32>
    %cst_7 = arith.constant 0.000000e+00 : f32
    %9 = vector.broadcast %cst_7 : f32 to vector<8x128xf32>
    %10 = arith.select %8, %5, %9 : vector<8x128xi1>, vector<8x128xf32>
    %cst_8 = arith.constant dense<0.000000e+00> : vector<8x128xf32>
    %11 = tpu.matmul %10, %3, %cst_8 {dimension_numbers = #tpu.dot_dimension_numbers<[1], [0], [0], [1], [0, 0, 1, 1], [], []>} : vector<8x128xf32>, vector<128x128xf32>, vector<8x128xf32> -> vector<8x128xf32>
    %12 = vector.broadcast %1 : vector<1x128xf32> to vector<8x128xf32>
    %13 = arith.mulf %12, %0 : vector<8x128xf32>
    %14 = arith.addf %13, %11 : vector<8x128xf32>
    %15 = vector.broadcast %2 : vector<1x128xf32> to vector<8x128xf32>
    %16 = arith.addf %14, %15 : vector<8x128xf32>
    %c0_9 = arith.constant 0 : index
    %c0_10 = arith.constant 0 : index
    %17 = vector.load %arg5[%c0_9, %c0_10] : memref<8x128xf32, #tpu.memory_space<vmem>>, vector<8x128xf32>
    tpu.vector_store %arg5[%c0_9, %c0_10], %16 {strides = array<i32>} : memref<8x128xf32, #tpu.memory_space<vmem>>, vector<8x128xf32>,
    return
  }
  func.func @transform_0(%arg0: i32) -> (i32, i32) {
    %c0_i32 = arith.constant 0 : i32
    %c0_i32_0 = arith.constant 0 : i32
    return %arg0, %c0_i32 : i32, i32
  }
  func.func @transform_1(%arg0: i32) -> (i32, i32) {
    %c0_i32 = arith.constant 0 : i32
    %c0_i32_0 = arith.constant 0 : i32
    %c0_i32_1 = arith.constant 0 : i32
    return %c0_i32, %c0_i32_0 : i32, i32
  }
  func.func @transform_2(%arg0: i32) -> (i32, i32) {
    %c0_i32 = arith.constant 0 : i32
    %c0_i32_0 = arith.constant 0 : i32
    %c0_i32_1 = arith.constant 0 : i32
    return %c0_i32, %c0_i32_0 : i32, i32
  }
  func.func @transform_3(%arg0: i32) -> (i32, i32) {
    %c0_i32 = arith.constant 0 : i32
    %c0_i32_0 = arith.constant 0 : i32
    %c0_i32_1 = arith.constant 0 : i32
    return %c0_i32, %c0_i32_0 : i32, i32
  }
  func.func @transform_4(%arg0: i32) -> (i32, i32) {
    %c0_i32 = arith.constant 0 : i32
    %c0_i32_0 = arith.constant 0 : i32
    return %arg0, %c0_i32 : i32, i32
  }
}

</mosaic_0001>

<bundles_post_ra>
// kernel: tpu_custom_call.1
= control target key start
LH: loop header
LB: loop body
LE: loop exit
PB: predicated region body
PF: predicated region fallthrough
CT: control target
= control target key end

     0   :  { %9 = vsyncpa [#allocation3], 0  ;;  %s885_s0 = inlined_call_operand.hbm [shape: f32[16,128], index: 0, kind: input, shape index: {}]   ;;  %s886_s1 = inlined_call_operand.vmem [shape: f32[1,128], index: 1, kind: input, shape index: {}]   ;;  %s887_s2 = inlined_call_operand.hbm [shape: f32[128,128], index: 2, kind: input, shape index: {}]   ;;  %s888_s3 = inlined_call_operand.vmem [shape: f32[1,128], index: 3, kind: input, shape index: {}]   ;;  %s889_s4 = inlined_call_operand.hbm [shape: f32[16,128], index: 4, kind: output, shape index: {}]  }
   0x1   :  { %11 = vsyncpa [#allocation3 + $0x1], 0 }
   0x2   :  { %12 = vsyncpa [#allocation6], 0 }
   0x3   :  { %13 = vsyncpa [#allocation4], 0 }
   0x4   :  { %15 = vsyncpa [#allocation4 + $0x1], 0  ;;  %s718_s15 = smov 0   ;;  %s720_s16 = smov 0  }
   0x5   :  { %s722_s17 = smov 0   ;;  %s724_s18 = smov 0  }
   0x6 LB: > { %s739_s19 = sadd.s32 4294967295, %s684_s18   ;;  %s432_s20 = sadd.s32 4294967294, %s684_s18   ;;  %s684_s18 = sphi %s724_s18, %s911_s18   ;;  %s680_s17 = sphi %s722_s17, %s910_s17   ;;  %s676_s16 = sphi %s720_s16, %s909_s16   ;;  %s672_s15 = sphi %s718_s15, %s908_s15  }
   0x7   : > { %p41_p0 = scmp.ne.s32.totalorder %s676_s16, %s672_s15  ;;  %p890_p1 = scmp.eq.s32.totalorder %s739_s19, 0 }
   0x8   : > { %p134_p3 = scmp.eq.s32.totalorder %s432_s20, 1  ;;  %p433_p5 = scmp.ge.s32.totalorder %s684_s18, 1 }
   0x9   : > { %p748_p4 = por %p890_p1, %p41_p0  ;;  %p141_p7 = scmp.lt.s32.totalorder %s684_s18, 3 }
   0xa   : > { %p753_p6 = por %p134_p3, %p41_p0  ;;  %s686_s24 = smov [#allocation5]  }
   0xb   : > { %s894_s21 = scalar_select %p748_p4, 1, 0 }
   0xc   : > { %s895_s22 = scalar_select %p753_p6, 1, 0 }
   0xd   : > { %p758_p8 = pnand %p433_p5, %p141_p7  ;;  %s156_s25 = sshll.u32 %s686_s24, 4  ;;  %s157_s25 = int_to_ptr.vmem [resolvable:$true] %s156_s25 }
   0xe   : > { %s772_s27 = sadd.s32 1, %s684_s18   ;;  %s28_s28 = sadd.s32 1, %s680_s17 }
   0xf   : > { %s896_s23 = scalar_select %p758_p8, 1, 0 }
  0x10   : > { %p509_p9 = pneg %p758_p8  ;;  %s25_s29 = ssub.s32 %s684_s18, %s772_s27 }
  0x11   : > { %s573_s30 = scalar_lea.vmem %s157_s25, 2048  ;;  %p581_p5 = scmp.lt.s32.totalorder %s157_s25, %s157_s25 }
  0x12   : > { %p767_p11 = pnand %p509_p9, %p890_p1  ;;  %p574_p13 = scmp.ne.s32.totalorder %s157_s25, %s573_s30 }
  0x13   : > { %p582_p7 = scmp.lt.s32.totalorder %s573_s30, %s573_s30 }
  0x14   : > { %p564_p12 = pneg %p767_p11 }
  0x15   : > { %p583_p10 = por %p582_p7, %p581_p5 }
  0x16   : > { %p576_p0 = pnand %p574_p13, %p564_p12 }
  0x18   : > { %p577_p3 = pneg %p576_p0 }
  0x1a   : > { %p584_p2 = pnand %p583_p10, %p577_p3 }
  0x1c   : > { %587 = shalt.err (!%p584_p2)
}
  0x1d   : > { %s687_s5 = smov 128   ;;  %s688_s6 = smov 8  }
  0x1e   : > { %512 = dma.hbm_to_vmem [thread:$0]  (!%p767_p11), %s887_s2, 2048, %s157_s25, [#allocation6], %s687_s5, %s687_s5, %s688_s6  }
  0x1f   : > { %p26_p9 = scmp.eq.s32.totalorder %s25_s29, 0  ;;  %p35_p12 = scmp.ne.s32.totalorder %s680_s17, %s676_s16 }
  0x20   : > { %p36_p10 = scmp.eq.s32.totalorder %s684_s18, 0  ;;  %p522_p2 = scmp.lt.s32.totalorder %s684_s18, 2 }
  0x21   : > { %s789_s9 = scalar_select %p26_p9, %s680_s17, %s28_s28  }
  0x22   : > { %p37_p13 = por %p36_p10, %p35_p12  ;;  %p898_p0 = scmp.eq.s32.totalorder %s739_s19, 1 }
  0x23   : > { %s173_s11 = sand.u32 1, %s680_s17   ;;  %s437_s12 = sshll.u32 %s684_s18, 7 }
  0x24   : > { %p793_p3 = por %p898_p0, %p35_p12  ;;  %s436_s13 = sshll.u32 %s173_s11, 3 }
  0x25   : > { %s802_s24 = scalar_lea.hbm %s885_s0, %s437_s12  ;;  %s177_s25 = scalar_lea.vmem [#allocation2], %s436_s13 }
  0x26   : > { %s899_s10 = scalar_select %p793_p3, 1, 0 }
  0x27   : > { %s184_s26 = sshll.u32 %s177_s25, 4  ;;  %p804_p11 = pnand %p522_p2, %p37_p13  ;;  %s185_s26 = int_to_ptr.vmem [resolvable:$true] %s184_s26 }
  0x28   : > { %s174_s29 = scalar_lea.sflag [#allocation3], %s173_s11  ;;  %s588_s30 = scalar_lea.hbm %s802_s24, 128 }
  0x29   : > { %p589_p5 = scmp.ne.s32.totalorder %s802_s24, %s588_s30  ;;  %p590_p7 = pneg %p804_p11 }
  0x2a   : > { %s593_s7 = scalar_lea.hbm %s885_s0, 256  ;;  %p594_p10 = scmp.lt.s32.totalorder %s802_s24, %s885_s0 }
  0x2b   : > { %p591_p9 = pnand %p590_p7, %p589_p5  ;;  %p595_p2 = scmp.lt.s32.totalorder %s593_s7, %s588_s30 }
  0x2d   : > { %p592_p12 = pneg %p591_p9  ;;  %p596_p13 = por %p595_p2, %p594_p10 }
  0x2f   : > { %p597_p0 = pnand %p596_p13, %p592_p12 }
  0x31   : > { %600 = shalt.err (!%p597_p0)
}
  0x32   : > { %s601_s13 = scalar_lea.vmem %s185_s26, 128  ;;  %s689_s11 = smov [#allocation2]  }
  0x33   : > { %p602_p1 = scmp.ne.s32.totalorder %s185_s26, %s601_s13  ;;  %s606_s14 = sshll.u32 %s689_s11, 4  ;;  %s607_s14 = int_to_ptr.vmem [resolvable:$false] %s606_s14 }
  0x34   : > { %s608_s20 = scalar_lea.vmem %s607_s14, 256  ;;  %p609_p5 = scmp.lt.s32.totalorder %s185_s26, %s607_s14 }
  0x35   : > { %p604_p6 = pnand %p602_p1, %p590_p7  ;;  %p610_p9 = scmp.lt.s32.totalorder %s608_s20, %s601_s13 }
  0x37   : > { %p605_p3 = pneg %p604_p6  ;;  %p611_p4 = por %p610_p9, %p609_p5 }
  0x39   : > { %p612_p8 = pnand %p611_p4, %p605_p3 }
  0x3b   : > { %615 = shalt.err (!%p612_p8)
}
  0x3c   : > { %516 = dma.hbm_to_vmem [thread:$0]  (!%p804_p11), %s802_s24, 128, %s185_s26, %s174_s29  }
  0x3d   : > { %p901_p12 = scmp.ne.s32.totalorder %s896_s23, 0 }
  0x3e   : > { %s825_s25 = sand.u32 (!%p901_p12), 1, %s676_s16   ;;  %p902_p1 = scmp.ne.s32.totalorder (!%p901_p12), %s894_s21, 0 }
  0x3f   : > { %193 = sbr.rel (%p901_p12) target bundleno = 315 (0x13b), region = 36  ;;  %s439_s30 = sshll.u32 (!%p901_p12), %s825_s25, 3 }
  0x40   : > { %s196_s5 = scalar_lea.sflag (!%p901_p12), [#allocation3], %s825_s25  ;;  %s831_s6 = scalar_lea.vmem (!%p901_p12), [#allocation2], %s439_s30 }
  0x44   : > { %659 = dma.done.wait (%p902_p1), %s196_s5, 128  }
  0x45   : > { %661 = vsyncadd (%p902_p1), %s196_s5, 4294967168  ;;  %p903_p4 = scmp.eq.s32.totalorder %s739_s19, 0 }
  0x47   : > { %663 = dma.done.wait (%p903_p4), [#allocation6], 2048   ;;  %p904_p6 = pmov %p903_p4 }
  0x48   : > { %v690_v0 = vmov 0.0   ;;  %vm691_vm0 = vmmov 0   ;;  %v246_v1 = vld [vmem:[#allocation5 + $0x78] sm:$0xff]  ;;  %v245_v2 = vld [vmem:[#allocation5 + $0x70] sm:$0xff]  ;;  %v244_v3 = vld [vmem:[#allocation5 + $0x68] sm:$0xff]  ;;  %v248_v13 = vlaneseq  ;;  %s446_s28 = sshll.u32 %s739_s19, 7 }
  0x49   : > { %665 = vsyncadd (%p904_p6), [#allocation6], 4294965248  ;;  %466 = vmatprep.subr.mxu0 %v690_v0  ;;  %498 = vmatprep.mubr.msk.f32.mxu0 %vm691_vm0, %v690_v0  ;;  %v243_v4 = vld [vmem:[#allocation5 + $0x60] sm:$0xff]  ;;  %v242_v5 = vld [vmem:[#allocation5 + $0x58] sm:$0xff]  ;;  %s227_s29 = scalar_lea.vmem [#allocation7], %s439_s30  ;;  %s350_s13 = scalar_lea.hbm %s889_s4, %s446_s28 }
  0x4a   : > { %467 = vmatpush3.msra.mxu0 %v246_v1  ;;  %v241_v6 = vld [vmem:[#allocation5 + $0x50] sm:$0xff]  ;;  %v240_v7 = vld [vmem:[#allocation5 + $0x48] sm:$0xff]  ;;  %v239_v8 = vld [vmem:[#allocation5 + $0x40] sm:$0xff]  ;;  %v249_v17 = vand.u32 127, %v248_v13  ;;  %s352_s7 = sshll.u32 %s227_s29, 4  ;;  %s339_s11 = scalar_lea.sflag [#allocation4], %s825_s25  ;;  %s353_s7 = int_to_ptr.vmem [resolvable:$true] %s352_s7 }
  0x4b   : > { %468 = vmatprep.subr.mxu0 %v690_v0  ;;  %v238_v9 = vld [vmem:[#allocation5 + $0x38] sm:$0xff]  ;;  %v237_v10 = vld [vmem:[#allocation5 + $0x30] sm:$0xff]  ;;  %v236_v11 = vld [vmem:[#allocation5 + $0x28] sm:$0xff]  ;;  %s616_s14 = scalar_lea.vmem %s353_s7, 128  ;;  %p905_p3 = scmp.ne.s32.totalorder %s899_s10, 0 }
  0x4c   : > { %469 = vmatpush3.msra.mxu0 %v245_v2  ;;  %v235_v12 = vld [vmem:[#allocation5 + $0x20] sm:$0xff]  ;;  %v234_v14 = vld [vmem:[#allocation5 + $0x18] sm:$0xff]  ;;  %v233_v15 = vld [vmem:[#allocation5 + $0x10] sm:$0xff]  ;;  %vm250_vm1 = vcmp.lt.s32.totalorder %v249_v17, 32  ;;  %p617_p8 = scmp.ne.s32.totalorder %s353_s7, %s616_s14  ;;  %s692_s20 = smov [#allocation7]  }
  0x4d   : > { %470 = vmatprep.subr.mxu0 %v690_v0  ;;  %v228_v16 = vld [vmem:[%s831_s6] sm:$0xff]  ;;  %v232_v18 = vld [vmem:[#allocation5 + $0x8] sm:$0xff]  ;;  %v231_v19 = vld [vmem:[#allocation5] sm:$0xff]  ;;  %s620_s19 = sshll.u32 %s692_s20, 4  ;;  %s621_s19 = int_to_ptr.vmem [resolvable:$false] %s620_s19 }
  0x4e   : > { %471 = vmatpush3.msra.mxu0 %v244_v3  ;;  %v247_v20 = vmax.f32 %v228_v16, 0.0  ;;  %v443_v21 = vld [vmem:[%s886_s1] ss:$0 sm:$0xff]  ;;  %p618_p11 = pnand %p617_p8, %p905_p3  ;;  %s622_s30 = scalar_lea.vmem %s621_s19, 256 }
  0x4f   : > { %472 = vmatprep.subr.mxu0 %v690_v0  ;;  %v328_v22 = vmul.f32 %v443_v21, %v228_v16  ;;  %v444_v23 = vld [vmem:[%s888_s3] ss:$0 sm:$0xff]  ;;  %p623_p10 = scmp.lt.s32.totalorder %s353_s7, %s621_s19  ;;  %p624_p2 = scmp.lt.s32.totalorder %s622_s30, %s616_s14 }
  0x50   : > { %473 = vmatpush3.msra.mxu0 %v243_v4  ;;  %p619_p7 = pneg %p618_p11 }
  0x51   : > { %474 = vmatprep.subr.mxu0 %v690_v0  ;;  %p625_p13 = por %p624_p2, %p623_p10 }
  0x52   : > { %475 = vmatpush3.msra.mxu0 %v242_v5 }
  0x53   : > { %476 = vmatprep.subr.mxu0 %v690_v0  ;;  %p626_p0 = pnand %p625_p13, %p619_p7 }
  0x54   : > { %477 = vmatpush3.msra.mxu0 %v241_v6 }
  0x55   : > { %478 = vmatprep.subr.mxu0 %v690_v0 }
  0x56   : > { %479 = vmatpush3.msra.mxu0 %v240_v7 }
  0x57   : > { %480 = vmatprep.subr.mxu0 %v690_v0 }
  0x58   : > { %481 = vmatpush3.msra.mxu0 %v239_v8 }
  0x59   : > { %482 = vmatprep.subr.mxu0 %v690_v0 }
  0x5a   : > { %483 = vmatpush3.msra.mxu0 %v238_v9 }
  0x5b   : > { %484 = vmatprep.subr.mxu0 %v690_v0 }
  0x5c   : > { %485 = vmatpush3.msra.mxu0 %v237_v10 }
  0x5d   : > { %486 = vmatprep.subr.mxu0 %v690_v0 }
  0x5e   : > { %487 = vmatpush3.msra.mxu0 %v236_v11 }
  0x5f   : > { %488 = vmatprep.subr.mxu0 %v690_v0 }
  0x60   : > { %489 = vmatpush3.msra.mxu0 %v235_v12 }
  0x61   : > { %490 = vmatprep.subr.mxu0 %v690_v0 }
  0x62   : > { %491 = vmatpush3.msra.mxu0 %v234_v14 }
  0x63   : > { %492 = vmatprep.subr.mxu0 %v690_v0 }
  0x64   : > { %493 = vmatpush3.msra.mxu0 %v233_v15 }
  0x65   : > { %494 = vmatprep.subr.mxu0 %v690_v0 }
  0x66   : > { %495 = vmatpush3.msra.mxu0 %v232_v18 }
  0x67   : > { %496 = vmatprep.subr.mxu0 %v690_v0 }
  0x68   : > { %497 = vmatpush3.msra.mxu0 %v231_v19 }
  0x69   : > { %499 = vmatmul.mubr.msk.f32.vlgmr.msra.gmra.mxu0 %vm250_vm1, %v247_v20 }
 0x129   : > { %v318_v24 = vpop.f32.mrf.mxu0 }
 0x12a   : > { %v329_v25 = vadd.f32 %v328_v22, %v318_v24 }
 0x12b   : > { %v500_v26 = vpop.f32.mrf.mxu0 }
 0x12c   : > { %v336_v27 = vadd.f32 %v444_v23, %v329_v25 }
 0x12e   : > { %337 = vst [vmem:[%s227_s29] sm:$0xff] %v336_v27 }
 0x12f   : > { %629 = shalt.err (!%p626_p0)
}
 0x130   : > { %s630_s5 = scalar_lea.hbm %s350_s13, 128  ;;  %s634_s21 = scalar_lea.hbm %s889_s4, 256 }
 0x131   : > { %p631_p5 = scmp.ne.s32.totalorder %s350_s13, %s630_s5  ;;  %p635_p1 = scmp.lt.s32.totalorder %s350_s13, %s889_s4 }
 0x132   : > { %p636_p4 = scmp.lt.s32.totalorder %s634_s21, %s630_s5 }
 0x133   : > { %p632_p9 = pnand %p631_p5, %p905_p3 }
 0x134   : > { %p637_p6 = por %p636_p4, %p635_p1 }
 0x135   : > { %p633_p12 = pneg %p632_p9 }
 0x137   : > { %p638_p8 = pnand %p637_p6, %p633_p12 }
 0x139   : > { %641 = shalt.err (!%p638_p8)
}
 0x13a   : > { %507 = dma.vmem_to_hbm [thread:$0]  (%p905_p3), %s353_s7, 128, %s350_s13, %s339_s11  }
 0x13b PF: > { %s364_s26 = sand.u32 1, %s672_s15   ;;  %p906_p11 = scmp.ne.s32.totalorder %s895_s22, 0 }
 0x13c   : > { %p907_p7 = scmp.ge.s32.totalorder %s684_s18, 2  ;;  %s365_s28 = scalar_lea.sflag [#allocation4], %s364_s26 }
 0x13e   : > { %p518_p10 = pnand %p907_p7, %p906_p11 }
 0x140   : > { %p519_p2 = pneg %p518_p10 }
 0x142   : > { %667 = dma.done.wait (%p519_p2), %s365_s28, 128  }
 0x143   : > { %669 = vsyncadd (%p519_p2), %s365_s28, 4294967168  ;;  %p18_p13 = scmp.ge.s32.totalorder %s772_s27, 4   ;;  %s908_s15 = smov %s676_s16 }
 0x144   : > { %s909_s16 = smov %s680_s17  ;;  %s910_s17 = smov %s789_s9 }
 0x145   : > { %s911_s18 = smov %s772_s27  ;;  %20 = sbr.rel (!%p18_p13) target bundleno = 6 (0x6), region = 85 }
 0x14a   :  { %370 = vsyncpa [#allocation3], 1 }
 0x14b   :  { %372 = vsyncpa [#allocation3 + $0x1], 1 }
 0x14c   :  { %373 = vsyncpa [#allocation6], 1 }
 0x14d   :  { %374 = vsyncpa [#allocation4], 1 }
 0x14e   :  { %376 = vsyncpa [#allocation4 + $0x1], 1 }

</bundles_post_ra>
